<compile_context>
chip_gen: v6e
topology: v6e:2x2x1
jax: 0.10.0
libtpu: 0.0.40
codegen_flags: <defaults>
</compile_context>

<pallas_src>
import functools

import jax
import jax.numpy as jnp
import numpy as np
from jax.experimental import pallas as pl
from jax.experimental.pallas import tpu as pltpu


def _round_up(x, mult):
    return ((x + mult - 1) // mult) * mult


def _pick_batch_block(b, rows_per_batch):
    """Largest divisor of b keeping the MLP LHS slab around 128 rows, while
    preserving >=2 grid steps (v7x megacore) whenever b allows it."""
    target = max(1, 128 // max(rows_per_batch, 1))
    divisors = [d for d in range(1, b + 1) if b % d == 0]
    cands = [d for d in divisors if d <= target and b // d >= 2]
    if not cands:
        cands = [d for d in divisors if d <= target] or [1]
    return max(cands)


def _mlp(x, wa, ba, wb, bb):
    # First Linear may run with bf16 operands (f32 accumulate on the MXU);
    # ReLU / second Linear stay in f32.
    h = jnp.dot(x.astype(wa.dtype), wa, preferred_element_type=jnp.float32) + ba
    h = jnp.maximum(h, 0.0)
    return jnp.dot(h, wb, preferred_element_type=jnp.float32) + bb


def _match_f_kernel(d0_ref, d1_ref,
                    w0a_ref, b0a_ref, w0b_ref, b0b_ref,
                    w1a_ref, b1a_ref, w1b_ref, b1b_ref,
                    *out_refs, top_k, with_sim):
    idx_ref = out_refs[-1]
    sim_ref = out_refs[0] if with_sim else None

    bt, din, m = d0_ref.shape
    n = d1_ref.shape[2]
    h = w0a_ref.shape[1]

    # PyTorch layout -> matmul layout, entirely on VMEM-resident data
    # (no wrapper-side HBM transpose pass).
    d0 = jnp.transpose(d0_ref[...], (0, 2, 1)).reshape(bt * m, din)   # (Bt*M, Din)
    d1 = jnp.transpose(d1_ref[...], (0, 2, 1)).reshape(bt * n, din)   # (Bt*N, Din)

    mdesc0 = _mlp(d0, w0a_ref[...], b0a_ref[...], w0b_ref[...], b0b_ref[...])  # (Bt*M, H)
    mdesc1 = _mlp(d1, w1a_ref[...], b1a_ref[...], w1b_ref[...], b1b_ref[...])  # (Bt*N, H)

    # Per-batch similarity einsum('bmd,bnd->bmn'); no transposed copy of
    # mdesc1 is materialized, contraction stays on the MXU.
    sim = jnp.einsum('bmd,bnd->bmn',
                     mdesc0.reshape(bt, m, h), mdesc1.reshape(bt, n, h),
                     preferred_element_type=jnp.float32)               # (Bt, M, N)

    if with_sim:
        sim_ref[...] = sim   # debug path only; default path never writes sim to HBM

    # ---- in-kernel top-k over the flattened (M*N) sim, per batch ----
    k_pad = idx_ref.shape[-1]                       # padded to a multiple of 128
    row_ids = jax.lax.broadcasted_iota(jnp.int32, (bt, m, n), 1)
    col_ids = jax.lax.broadcasted_iota(jnp.int32, (bt, m, n), 2)
    flat_ids = row_ids * n + col_ids                # int32: exact at any M*N

    k_iota = jax.lax.broadcasted_iota(jnp.int32, (bt, k_pad), 1)
    idx_out = jnp.zeros((bt, k_pad), jnp.int32)
    work = sim
    sentinel = jnp.int32(m * n)
    neg_inf = jnp.float32(-jnp.inf)

    # K-step vectorized arg-max; tie-break = lowest flat index (matches
    # lax.top_k).  top_k is tiny and static here; switch to
    # lax.fori_loop(..., unroll=True) with an (idx_out, work) carry if it grows.
    for k in range(top_k):
        mx = jnp.max(jnp.max(work, axis=2, keepdims=True),
                     axis=1, keepdims=True)                             # (Bt,1,1)
        cand = jnp.where(work == mx, flat_ids, sentinel)
        best = jnp.min(jnp.min(cand, axis=2, keepdims=True),
                       axis=1, keepdims=True)                           # (Bt,1,1) int32
        idx_out = jnp.where(k_iota == k, best.reshape(bt, 1), idx_out)
        work = jnp.where(flat_ids == best, neg_inf, work)

    idx_ref[0] = idx_out   # single lane-dense (Bt, k_pad) unmasked store


def match_f(f2d, f3d, params, top_k, *, return_sim=False,
            use_bf16_first_linear=True):
    """f2d: (B, Din, M), f3d: (B, Din, N) -- PyTorch layout (channels first).
    params: (w0a, b0a, w0b, b0b, w1a, b1a, w1b, b1b), weights in (in, out).
    Returns top-k flat indices (B, top_k); with return_sim=True also returns
    the (B, M, N) similarity matrix (debug only)."""
    w0a, b0a, w0b, b0b, w1a, b1a, w1b, b1b = params
    b, din, m = f2d.shape
    n = f3d.shape[2]
    h = w0a.shape[1]

    bt = _pick_batch_block(b, max(m, n))
    steps = b // bt
    k_pad = _round_up(max(top_k, 1), 128)

    if use_bf16_first_linear:
        # bf16 MXU operands on the first Linear only; descriptors are cast
        # in-kernel (VPU convert on VMEM data), weights at the boundary.
        w0a = w0a.astype(jnp.bfloat16)
        w1a = w1a.astype(jnp.bfloat16)

    kernel = functools.partial(_match_f_kernel, top_k=top_k, with_sim=return_sim)

    out_shape = [jax.ShapeDtypeStruct((steps, bt, k_pad), jnp.int32)]
    out_specs = [pl.BlockSpec((1, bt, k_pad), lambda i: (i, 0, 0))]
    if return_sim:
        out_shape = [jax.ShapeDtypeStruct((b, m, n), jnp.float32)] + out_shape
        out_specs = [pl.BlockSpec((bt, m, n), lambda i: (i, 0, 0))] + out_specs

    def weight_spec(shape):
        return pl.BlockSpec(shape, lambda i: (0, 0))   # constant block: no re-fetch

    outs = pl.pallas_call(
        kernel,
        out_shape=tuple(out_shape),
        grid=(steps,),
        in_specs=[
            pl.BlockSpec((bt, din, m), lambda i: (i, 0, 0)),
            pl.BlockSpec((bt, din, n), lambda i: (i, 0, 0)),
            weight_spec((din, h)), weight_spec((1, h)),
            weight_spec((h, h)), weight_spec((1, h)),
            weight_spec((din, h)), weight_spec((1, h)),
            weight_spec((h, h)), weight_spec((1, h)),
        ],
        out_specs=tuple(out_specs),
        compiler_params=pltpu.CompilerParams(
            dimension_semantics=("parallel",)),
    )(f2d, f3d,
      w0a, b0a.reshape(1, h), w0b, b0b.reshape(1, h),
      w1a, b1a.reshape(1, h), w1b, b1b.reshape(1, h))

    if return_sim:
        sim, idx = outs
        return sim, idx.reshape(b, k_pad)[:, :top_k]
    (idx,) = outs
    return idx.reshape(b, k_pad)[:, :top_k]


def _reference_sim(f2d, f3d, params, *, use_bf16_first_linear=True):
    """Pure-JAX reference for the similarity matrix, mirroring the kernel's
    precision choices (bf16 first Linear, f32 everywhere else)."""
    w0a, b0a, w0b, b0b, w1a, b1a, w1b, b1b = params
    hi = jax.lax.Precision.HIGHEST
    d0 = jnp.transpose(f2d, (0, 2, 1))
    d1 = jnp.transpose(f3d, (0, 2, 1))
    if use_bf16_first_linear:
        d0c, d1c = d0.astype(jnp.bfloat16), d1.astype(jnp.bfloat16)
        w0ac, w1ac = w0a.astype(jnp.bfloat16), w1a.astype(jnp.bfloat16)
    else:
        d0c, d1c, w0ac, w1ac = d0, d1, w0a, w1a
    m0 = jnp.maximum(jnp.matmul(d0c, w0ac, precision=hi,
                                preferred_element_type=jnp.float32) + b0a, 0.0)
    m0 = jnp.matmul(m0, w0b, precision=hi) + b0b
    m1 = jnp.maximum(jnp.matmul(d1c, w1ac, precision=hi,
                                preferred_element_type=jnp.float32) + b1a, 0.0)
    m1 = jnp.matmul(m1, w1b, precision=hi) + b1b
    return jnp.einsum('bmd,bnd->bmn', m0, m1, precision=hi)


if __name__ == "__main__":
    B, DIN, HID, M, N, TOP_K = 2, 64, 32, 16, 12, 4

    key = jax.random.PRNGKey(0)
    keys = jax.random.split(key, 10)

    # PyTorch layout: each example is (input_dim, seq); the module transposes.
    f2d = jax.random.normal(keys[0], (B, DIN, M), dtype=jnp.float32)
    f3d = jax.random.normal(keys[1], (B, DIN, N), dtype=jnp.float32)

    # PyTorch Linear-style uniform init, weights already in (in, out) layout.
    def lin(kw, kb, fan_in, fan_out):
        bound = 1.0 / np.sqrt(fan_in)
        w = jax.random.uniform(kw, (fan_in, fan_out), jnp.float32, -bound, bound)
        bvec = jax.random.uniform(kb, (fan_out,), jnp.float32, -bound, bound)
        return w, bvec

    w0a, b0a = lin(keys[2], keys[3], DIN, HID)
    w0b, b0b = lin(keys[4], keys[5], HID, HID)
    w1a, b1a = lin(keys[6], keys[7], DIN, HID)
    w1b, b1b = lin(keys[8], keys[9], HID, HID)
    params = (w0a, b0a, w0b, b0b, w1a, b1a, w1b, b1b)

    # Fast path (the PyTorch module's actual return): indices only, no sim
    # HBM writeback at all.
    idx = match_f(f2d, f3d, params, TOP_K)
    jax.block_until_ready(idx)

    # Debug path: also emit sim so the in-kernel top-k can be validated
    # exactly against lax.top_k on the kernel's own similarity matrix.
    sim_dbg, idx_dbg = match_f(f2d, f3d, params, TOP_K, return_sim=True)
    jax.block_until_ready((sim_dbg, idx_dbg))

    # 1) MLPs + similarity match a precision-mirrored pure-JAX reference.
    ref_sim = _reference_sim(f2d, f3d, params)
    np.testing.assert_allclose(np.asarray(sim_dbg), np.asarray(ref_sim),
                               rtol=2e-3, atol=2e-3)

    # 2) In-kernel top-k matches lax.top_k on the kernel's own sim (exact).
    _, idx_check = jax.lax.top_k(sim_dbg.reshape(B, M * N), TOP_K)
    np.testing.assert_array_equal(np.asarray(idx_dbg), np.asarray(idx_check))

    # 3) Fast path (no sim output) produces the same indices as debug path.
    np.testing.assert_array_equal(np.asarray(idx), np.asarray(idx_dbg))

    print("KERNEL_OK")
</pallas_src>

<mosaic_0001>
module attributes {stable_mosaic.version = 11 : i64} {
  func.func @_match_f_kernel(%arg0: i32, %arg1: memref<1x64x16xf32, #tpu.memory_space<vmem>>, %arg2: memref<1x64x12xf32, #tpu.memory_space<vmem>>, %arg3: memref<64x32xbf16, #tpu.memory_space<vmem>>, %arg4: memref<1x32xf32, #tpu.memory_space<vmem>>, %arg5: memref<32x32xf32, #tpu.memory_space<vmem>>, %arg6: memref<1x32xf32, #tpu.memory_space<vmem>>, %arg7: memref<64x32xbf16, #tpu.memory_space<vmem>>, %arg8: memref<1x32xf32, #tpu.memory_space<vmem>>, %arg9: memref<32x32xf32, #tpu.memory_space<vmem>>, %arg10: memref<1x32xf32, #tpu.memory_space<vmem>>, %arg11: memref<1x1x128xi32, #tpu.memory_space<vmem>>) attributes {dimension_semantics = [#tpu.dimension_semantics<parallel>], iteration_bounds = array<i64: 2>, scalar_prefetch = 0 : i64, scratch_operands = 0 : i64, tpu.core_type = #tpu.core_type<tc>, window_params = [{transform_indices = @transform_0, window_bounds = array<i64: 1, 64, 16>}, {transform_indices = @transform_1, window_bounds = array<i64: 1, 64, 12>}, {pipeline_mode = #tpu.pipeline_mode<synchronous>, transform_indices = @transform_2, window_bounds = array<i64: 64, 32>}, {pipeline_mode = #tpu.pipeline_mode<synchronous>, transform_indices = @transform_3, window_bounds = array<i64: 1, 32>}, {pipeline_mode = #tpu.pipeline_mode<synchronous>, transform_indices = @transform_4, window_bounds = array<i64: 32, 32>}, {pipeline_mode = #tpu.pipeline_mode<synchronous>, transform_indices = @transform_5, window_bounds = array<i64: 1, 32>}, {pipeline_mode = #tpu.pipeline_mode<synchronous>, transform_indices = @transform_6, window_bounds = array<i64: 64, 32>}, {pipeline_mode = #tpu.pipeline_mode<synchronous>, transform_indices = @transform_7, window_bounds = array<i64: 1, 32>}, {pipeline_mode = #tpu.pipeline_mode<synchronous>, transform_indices = @transform_8, window_bounds = array<i64: 32, 32>}, {pipeline_mode = #tpu.pipeline_mode<synchronous>, transform_indices = @transform_9, window_bounds = array<i64: 1, 32>}, {transform_indices = @transform_10, window_bounds = array<i64: 1, 1, 128>}]} {
    %c0 = arith.constant 0 : index
    %c0_0 = arith.constant 0 : index
    %c0_1 = arith.constant 0 : index
    %0 = vector.load %arg1[%c0, %c0_0, %c0_1] : memref<1x64x16xf32, #tpu.memory_space<vmem>>, vector<1x64x16xf32>
    %1 = tpu.transpose %0, [0, 2, 1] : vector<1x64x16xf32> -> vector<1x16x64xf32>
    %2 = vector.shape_cast %1 : vector<1x16x64xf32> to vector<16x64xf32>
    %c0_2 = arith.constant 0 : index
    %c0_3 = arith.constant 0 : index
    %c0_4 = arith.constant 0 : index
    %3 = vector.load %arg2[%c0_2, %c0_3, %c0_4] : memref<1x64x12xf32, #tpu.memory_space<vmem>>, vector<1x64x12xf32>
    %4 = tpu.transpose %3, [0, 2, 1] : vector<1x64x12xf32> -> vector<1x12x64xf32>
    %5 = vector.shape_cast %4 : vector<1x12x64xf32> to vector<12x64xf32>
    %c0_5 = arith.constant 0 : index
    %c0_6 = arith.constant 0 : index
    %6 = vector.load %arg3[%c0_5, %c0_6] : memref<64x32xbf16, #tpu.memory_space<vmem>>, vector<64x32xbf16>
    %c0_7 = arith.constant 0 : index
    %c0_8 = arith.constant 0 : index
    %7 = vector.load %arg4[%c0_7, %c0_8] : memref<1x32xf32, #tpu.memory_space<vmem>>, vector<1x32xf32>
    %c0_9 = arith.constant 0 : index
    %c0_10 = arith.constant 0 : index
    %8 = vector.load %arg5[%c0_9, %c0_10] : memref<32x32xf32, #tpu.memory_space<vmem>>, vector<32x32xf32>
    %c0_11 = arith.constant 0 : index
    %c0_12 = arith.constant 0 : index
    %9 = vector.load %arg6[%c0_11, %c0_12] : memref<1x32xf32, #tpu.memory_space<vmem>>, vector<1x32xf32>
    %10 = arith.truncf %2 : vector<16x64xf32> to vector<16x64xbf16>
    %cst = arith.constant dense<0.000000e+00> : vector<16x32xf32>
    %11 = tpu.matmul %10, %6, %cst {dimension_numbers = #tpu.dot_dimension_numbers<[1], [0], [0], [1], [0, 0, 1, 1], [], []>} : vector<16x64xbf16>, vector<64x32xbf16>, vector<16x32xf32> -> vector<16x32xf32>
    %12 = vector.broadcast %7 : vector<1x32xf32> to vector<16x32xf32>
    %13 = arith.addf %11, %12 : vector<16x32xf32>
    %cst_13 = arith.constant 0.000000e+00 : f32
    %14 = vector.broadcast %cst_13 : f32 to vector<16x32xf32>
    %15 = arith.maximumf %13, %14 : vector<16x32xf32>
    %cst_14 = arith.constant dense<0.000000e+00> : vector<16x32xf32>
    %16 = tpu.matmul %15, %8, %cst_14 {dimension_numbers = #tpu.dot_dimension_numbers<[1], [0], [0], [1], [0, 0, 1, 1], [], []>} : vector<16x32xf32>, vector<32x32xf32>, vector<16x32xf32> -> vector<16x32xf32>
    %17 = vector.broadcast %9 : vector<1x32xf32> to vector<16x32xf32>
    %18 = arith.addf %16, %17 : vector<16x32xf32>
    %c0_15 = arith.constant 0 : index
    %c0_16 = arith.constant 0 : index
    %19 = vector.load %arg7[%c0_15, %c0_16] : memref<64x32xbf16, #tpu.memory_space<vmem>>, vector<64x32xbf16>
    %c0_17 = arith.constant 0 : index
    %c0_18 = arith.constant 0 : index
    %20 = vector.load %arg8[%c0_17, %c0_18] : memref<1x32xf32, #tpu.memory_space<vmem>>, vector<1x32xf32>
    %c0_19 = arith.constant 0 : index
    %c0_20 = arith.constant 0 : index
    %21 = vector.load %arg9[%c0_19, %c0_20] : memref<32x32xf32, #tpu.memory_space<vmem>>, vector<32x32xf32>
    %c0_21 = arith.constant 0 : index
    %c0_22 = arith.constant 0 : index
    %22 = vector.load %arg10[%c0_21, %c0_22] : memref<1x32xf32, #tpu.memory_space<vmem>>, vector<1x32xf32>
    %23 = arith.truncf %5 : vector<12x64xf32> to vector<12x64xbf16>
    %cst_23 = arith.constant dense<0.000000e+00> : vector<12x32xf32>
    %24 = tpu.matmul %23, %19, %cst_23 {dimension_numbers = #tpu.dot_dimension_numbers<[1], [0], [0], [1], [0, 0, 1, 1], [], []>} : vector<12x64xbf16>, vector<64x32xbf16>, vector<12x32xf32> -> vector<12x32xf32>
    %25 = vector.broadcast %20 : vector<1x32xf32> to vector<12x32xf32>
    %26 = arith.addf %24, %25 : vector<12x32xf32>
    %cst_24 = arith.constant 0.000000e+00 : f32
    %27 = vector.broadcast %cst_24 : f32 to vector<12x32xf32>
    %28 = arith.maximumf %26, %27 : vector<12x32xf32>
    %cst_25 = arith.constant dense<0.000000e+00> : vector<12x32xf32>
    %29 = tpu.matmul %28, %21, %cst_25 {dimension_numbers = #tpu.dot_dimension_numbers<[1], [0], [0], [1], [0, 0, 1, 1], [], []>} : vector<12x32xf32>, vector<32x32xf32>, vector<12x32xf32> -> vector<12x32xf32>
    %30 = vector.broadcast %22 : vector<1x32xf32> to vector<12x32xf32>
    %31 = arith.addf %29, %30 : vector<12x32xf32>
    %32 = vector.shape_cast %18 : vector<16x32xf32> to vector<1x16x32xf32>
    %33 = vector.shape_cast %31 : vector<12x32xf32> to vector<1x12x32xf32>
    "tpu.trace_start"() <{level = 10 : i32, message = "bmd,bnd->bmn"}> : () -> ()
    %cst_26 = arith.constant dense<0.000000e+00> : vector<1x16x12xf32>
    %34 = tpu.matmul %32, %33, %cst_26 {dimension_numbers = #tpu.dot_dimension_numbers<[2], [2], [1], [1], [0, 0, 0, 1, 1, 1], [0], [0]>} : vector<1x16x32xf32>, vector<1x12x32xf32>, vector<1x16x12xf32> -> vector<1x16x12xf32>
    "tpu.trace_stop"() : () -> ()
    %35 = tpu.iota {dimensions = array<i32: 1>} : vector<1x16x12xi32>
    %36 = tpu.iota {dimensions = array<i32: 2>} : vector<1x16x12xi32>
    %c12_i32 = arith.constant 12 : i32
    %37 = vector.broadcast %c12_i32 : i32 to vector<1x16x12xi32>
    %38 = arith.muli %35, %37 : vector<1x16x12xi32>
    %39 = arith.addi %38, %36 : vector<1x16x12xi32>
    %40 = tpu.iota {dimensions = array<i32: 1>} : vector<1x128xi32>
    %c0_i32 = arith.constant 0 : i32
    %41 = vector.broadcast %c0_i32 : i32 to vector<1x128xi32>
    %cst_27 = arith.constant dense<0xFF800000> : vector<1x16xf32>
    %42 = vector.multi_reduction <maximumf>, %34, %cst_27 [2] : vector<1x16x12xf32> to vector<1x16xf32>
    %43 = vector.shape_cast %42 : vector<1x16xf32> to vector<1x16x1xf32>
    %cst_28 = arith.constant dense<0xFF800000> : vector<1x1xf32>
    %44 = vector.multi_reduction <maximumf>, %43, %cst_28 [1] : vector<1x16x1xf32> to vector<1x1xf32>
    %45 = vector.shape_cast %44 : vector<1x1xf32> to vector<1x1x1xf32>
    %46 = vector.broadcast %45 : vector<1x1x1xf32> to vector<1x16x12xf32>
    %47 = arith.cmpf oeq, %34, %46 : vector<1x16x12xf32>
    %c192_i32 = arith.constant 192 : i32
    %48 = vector.broadcast %c192_i32 : i32 to vector<1x16x12xi32>
    %49 = arith.select %47, %39, %48 : vector<1x16x12xi1>, vector<1x16x12xi32>
    %cst_29 = arith.constant dense<2147483647> : vector<1x16xi32>
    %50 = vector.multi_reduction <minsi>, %49, %cst_29 [2] : vector<1x16x12xi32> to vector<1x16xi32>
    %51 = vector.shape_cast %50 : vector<1x16xi32> to vector<1x16x1xi32>
    %cst_30 = arith.constant dense<2147483647> : vector<1x1xi32>
    %52 = vector.multi_reduction <minsi>, %51, %cst_30 [1] : vector<1x16x1xi32> to vector<1x1xi32>
    %53 = vector.shape_cast %52 : vector<1x1xi32> to vector<1x1x1xi32>
    %c0_i32_31 = arith.constant 0 : i32
    %54 = vector.broadcast %c0_i32_31 : i32 to vector<1x128xi32>
    %55 = arith.cmpi eq, %40, %54 : vector<1x128xi32>
    %56 = vector.shape_cast %53 : vector<1x1x1xi32> to vector<1x1xi32>
    %57 = vector.shape_cast %56 : vector<1x1xi32> to vector<1x1xi32>
    %58 = vector.broadcast %57 : vector<1x1xi32> to vector<1x128xi32>
    %59 = arith.select %55, %58, %41 : vector<1x128xi1>, vector<1x128xi32>
    %60 = vector.broadcast %53 : vector<1x1x1xi32> to vector<1x16x12xi32>
    %61 = arith.cmpi eq, %39, %60 : vector<1x16x12xi32>
    %cst_32 = arith.constant 0xFF800000 : f32
    %62 = vector.broadcast %cst_32 : f32 to vector<1x16x12xf32>
    %63 = arith.select %61, %62, %34 : vector<1x16x12xi1>, vector<1x16x12xf32>
    %cst_33 = arith.constant dense<0xFF800000> : vector<1x16xf32>
    %64 = vector.multi_reduction <maximumf>, %63, %cst_33 [2] : vector<1x16x12xf32> to vector<1x16xf32>
    %65 = vector.shape_cast %64 : vector<1x16xf32> to vector<1x16x1xf32>
    %cst_34 = arith.constant dense<0xFF800000> : vector<1x1xf32>
    %66 = vector.multi_reduction <maximumf>, %65, %cst_34 [1] : vector<1x16x1xf32> to vector<1x1xf32>
    %67 = vector.shape_cast %66 : vector<1x1xf32> to vector<1x1x1xf32>
    %68 = vector.broadcast %67 : vector<1x1x1xf32> to vector<1x16x12xf32>
    %69 = arith.cmpf oeq, %63, %68 : vector<1x16x12xf32>
    %c192_i32_35 = arith.constant 192 : i32
    %70 = vector.broadcast %c192_i32_35 : i32 to vector<1x16x12xi32>
    %71 = arith.select %69, %39, %70 : vector<1x16x12xi1>, vector<1x16x12xi32>
    %cst_36 = arith.constant dense<2147483647> : vector<1x16xi32>
    %72 = vector.multi_reduction <minsi>, %71, %cst_36 [2] : vector<1x16x12xi32> to vector<1x16xi32>
    %73 = vector.shape_cast %72 : vector<1x16xi32> to vector<1x16x1xi32>
    %cst_37 = arith.constant dense<2147483647> : vector<1x1xi32>
    %74 = vector.multi_reduction <minsi>, %73, %cst_37 [1] : vector<1x16x1xi32> to vector<1x1xi32>
    %75 = vector.shape_cast %74 : vector<1x1xi32> to vector<1x1x1xi32>
    %c1_i32 = arith.constant 1 : i32
    %76 = vector.broadcast %c1_i32 : i32 to vector<1x128xi32>
    %77 = arith.cmpi eq, %40, %76 : vector<1x128xi32>
    %78 = vector.shape_cast %75 : vector<1x1x1xi32> to vector<1x1xi32>
    %79 = vector.shape_cast %78 : vector<1x1xi32> to vector<1x1xi32>
    %80 = vector.broadcast %79 : vector<1x1xi32> to vector<1x128xi32>
    %81 = arith.select %77, %80, %59 : vector<1x128xi1>, vector<1x128xi32>
    %82 = vector.broadcast %75 : vector<1x1x1xi32> to vector<1x16x12xi32>
    %83 = arith.cmpi eq, %39, %82 : vector<1x16x12xi32>
    %cst_38 = arith.constant 0xFF800000 : f32
    %84 = vector.broadcast %cst_38 : f32 to vector<1x16x12xf32>
    %85 = arith.select %83, %84, %63 : vector<1x16x12xi1>, vector<1x16x12xf32>
    %cst_39 = arith.constant dense<0xFF800000> : vector<1x16xf32>
    %86 = vector.multi_reduction <maximumf>, %85, %cst_39 [2] : vector<1x16x12xf32> to vector<1x16xf32>
    %87 = vector.shape_cast %86 : vector<1x16xf32> to vector<1x16x1xf32>
    %cst_40 = arith.constant dense<0xFF800000> : vector<1x1xf32>
    %88 = vector.multi_reduction <maximumf>, %87, %cst_40 [1] : vector<1x16x1xf32> to vector<1x1xf32>
    %89 = vector.shape_cast %88 : vector<1x1xf32> to vector<1x1x1xf32>
    %90 = vector.broadcast %89 : vector<1x1x1xf32> to vector<1x16x12xf32>
    %91 = arith.cmpf oeq, %85, %90 : vector<1x16x12xf32>
    %c192_i32_41 = arith.constant 192 : i32
    %92 = vector.broadcast %c192_i32_41 : i32 to vector<1x16x12xi32>
    %93 = arith.select %91, %39, %92 : vector<1x16x12xi1>, vector<1x16x12xi32>
    %cst_42 = arith.constant dense<2147483647> : vector<1x16xi32>
    %94 = vector.multi_reduction <minsi>, %93, %cst_42 [2] : vector<1x16x12xi32> to vector<1x16xi32>
    %95 = vector.shape_cast %94 : vector<1x16xi32> to vector<1x16x1xi32>
    %cst_43 = arith.constant dense<2147483647> : vector<1x1xi32>
    %96 = vector.multi_reduction <minsi>, %95, %cst_43 [1] : vector<1x16x1xi32> to vector<1x1xi32>
    %97 = vector.shape_cast %96 : vector<1x1xi32> to vector<1x1x1xi32>
    %c2_i32 = arith.constant 2 : i32
    %98 = vector.broadcast %c2_i32 : i32 to vector<1x128xi32>
    %99 = arith.cmpi eq, %40, %98 : vector<1x128xi32>
    %100 = vector.shape_cast %97 : vector<1x1x1xi32> to vector<1x1xi32>
    %101 = vector.shape_cast %100 : vector<1x1xi32> to vector<1x1xi32>
    %102 = vector.broadcast %101 : vector<1x1xi32> to vector<1x128xi32>
    %103 = arith.select %99, %102, %81 : vector<1x128xi1>, vector<1x128xi32>
    %104 = vector.broadcast %97 : vector<1x1x1xi32> to vector<1x16x12xi32>
    %105 = arith.cmpi eq, %39, %104 : vector<1x16x12xi32>
    %cst_44 = arith.constant 0xFF800000 : f32
    %106 = vector.broadcast %cst_44 : f32 to vector<1x16x12xf32>
    %107 = arith.select %105, %106, %85 : vector<1x16x12xi1>, vector<1x16x12xf32>
    %cst_45 = arith.constant dense<0xFF800000> : vector<1x16xf32>
    %108 = vector.multi_reduction <maximumf>, %107, %cst_45 [2] : vector<1x16x12xf32> to vector<1x16xf32>
    %109 = vector.shape_cast %108 : vector<1x16xf32> to vector<1x16x1xf32>
    %cst_46 = arith.constant dense<0xFF800000> : vector<1x1xf32>
    %110 = vector.multi_reduction <maximumf>, %109, %cst_46 [1] : vector<1x16x1xf32> to vector<1x1xf32>
    %111 = vector.shape_cast %110 : vector<1x1xf32> to vector<1x1x1xf32>
    %112 = vector.broadcast %111 : vector<1x1x1xf32> to vector<1x16x12xf32>
    %113 = arith.cmpf oeq, %107, %112 : vector<1x16x12xf32>
    %c192_i32_47 = arith.constant 192 : i32
    %114 = vector.broadcast %c192_i32_47 : i32 to vector<1x16x12xi32>
    %115 = arith.select %113, %39, %114 : vector<1x16x12xi1>, vector<1x16x12xi32>
    %cst_48 = arith.constant dense<2147483647> : vector<1x16xi32>
    %116 = vector.multi_reduction <minsi>, %115, %cst_48 [2] : vector<1x16x12xi32> to vector<1x16xi32>
    %117 = vector.shape_cast %116 : vector<1x16xi32> to vector<1x16x1xi32>
    %cst_49 = arith.constant dense<2147483647> : vector<1x1xi32>
    %118 = vector.multi_reduction <minsi>, %117, %cst_49 [1] : vector<1x16x1xi32> to vector<1x1xi32>
    %119 = vector.shape_cast %118 : vector<1x1xi32> to vector<1x1x1xi32>
    %c3_i32 = arith.constant 3 : i32
    %120 = vector.broadcast %c3_i32 : i32 to vector<1x128xi32>
    %121 = arith.cmpi eq, %40, %120 : vector<1x128xi32>
    %122 = vector.shape_cast %119 : vector<1x1x1xi32> to vector<1x1xi32>
    %123 = vector.shape_cast %122 : vector<1x1xi32> to vector<1x1xi32>
    %124 = vector.broadcast %123 : vector<1x1xi32> to vector<1x128xi32>
    %125 = arith.select %121, %124, %103 : vector<1x128xi1>, vector<1x128xi32>
    %c0_50 = arith.constant 0 : index
    %c0_51 = arith.constant 0 : index
    %c0_52 = arith.constant 0 : index
    %126 = vector.load %arg11[%c0_50, %c0_51, %c0_52] : memref<1x1x128xi32, #tpu.memory_space<vmem>>, vector<1x1x128xi32>
    %127 = vector.shape_cast %126 : vector<1x1x128xi32> to vector<1x128xi32>
    %128 = vector.shape_cast %125 : vector<1x128xi32> to vector<1x1x128xi32>
    tpu.vector_store %arg11[%c0_50, %c0_51, %c0_52], %128 {strides = array<i32>} : memref<1x1x128xi32, #tpu.memory_space<vmem>>, vector<1x1x128xi32>,
    return
  }
  func.func @transform_0(%arg0: i32) -> (i32, i32, i32) {
    %c0_i32 = arith.constant 0 : i32
    %c0_i32_0 = arith.constant 0 : i32
    %c0_i32_1 = arith.constant 0 : i32
    return %arg0, %c0_i32, %c0_i32_0 : i32, i32, i32
  }
  func.func @transform_1(%arg0: i32) -> (i32, i32, i32) {
    %c0_i32 = arith.constant 0 : i32
    %c0_i32_0 = arith.constant 0 : i32
    %c0_i32_1 = arith.constant 0 : i32
    return %arg0, %c0_i32, %c0_i32_0 : i32, i32, i32
  }
  func.func @transform_2(%arg0: i32) -> (i32, i32) {
    %c0_i32 = arith.constant 0 : i32
    %c0_i32_0 = arith.constant 0 : i32
    %c0_i32_1 = arith.constant 0 : i32
    return %c0_i32, %c0_i32_0 : i32, i32
  }
  func.func @transform_3(%arg0: i32) -> (i32, i32) {
    %c0_i32 = arith.constant 0 : i32
    %c0_i32_0 = arith.constant 0 : i32
    %c0_i32_1 = arith.constant 0 : i32
    return %c0_i32, %c0_i32_0 : i32, i32
  }
  func.func @transform_4(%arg0: i32) -> (i32, i32) {
    %c0_i32 = arith.constant 0 : i32
    %c0_i32_0 = arith.constant 0 : i32
    %c0_i32_1 = arith.constant 0 : i32
    return %c0_i32, %c0_i32_0 : i32, i32
  }
  func.func @transform_5(%arg0: i32) -> (i32, i32) {
    %c0_i32 = arith.constant 0 : i32
    %c0_i32_0 = arith.constant 0 : i32
    %c0_i32_1 = arith.constant 0 : i32
    return %c0_i32, %c0_i32_0 : i32, i32
  }
  func.func @transform_6(%arg0: i32) -> (i32, i32) {
    %c0_i32 = arith.constant 0 : i32
    %c0_i32_0 = arith.constant 0 : i32
    %c0_i32_1 = arith.constant 0 : i32
    return %c0_i32, %c0_i32_0 : i32, i32
  }
  func.func @transform_7(%arg0: i32) -> (i32, i32) {
    %c0_i32 = arith.constant 0 : i32
    %c0_i32_0 = arith.constant 0 : i32
    %c0_i32_1 = arith.constant 0 : i32
    return %c0_i32, %c0_i32_0 : i32, i32
  }
  func.func @transform_8(%arg0: i32) -> (i32, i32) {
    %c0_i32 = arith.constant 0 : i32
    %c0_i32_0 = arith.constant 0 : i32
    %c0_i32_1 = arith.constant 0 : i32
    return %c0_i32, %c0_i32_0 : i32, i32
  }
  func.func @transform_9(%arg0: i32) -> (i32, i32) {
    %c0_i32 = arith.constant 0 : i32
    %c0_i32_0 = arith.constant 0 : i32
    %c0_i32_1 = arith.constant 0 : i32
    return %c0_i32, %c0_i32_0 : i32, i32
  }
  func.func @transform_10(%arg0: i32) -> (i32, i32, i32) {
    %c0_i32 = arith.constant 0 : i32
    %c0_i32_0 = arith.constant 0 : i32
    %c0_i32_1 = arith.constant 0 : i32
    return %arg0, %c0_i32, %c0_i32_0 : i32, i32, i32
  }
}

</mosaic_0001>

<bundles_post_ra>
// kernel: tpu_custom_call.1
= control target key start
LH: loop header
LB: loop body
LE: loop exit
PB: predicated region body
PF: predicated region fallthrough
CT: control target
= control target key end

     0   :  { %15 = vsyncpa [#allocation3], 0  ;;  %s1812_s0 = inlined_call_operand.vmem [shape: f32[2,64,16], index: 0, kind: input, shape index: {}]   ;;  %s1813_s1 = inlined_call_operand.vmem [shape: f32[2,64,12], index: 1, kind: input, shape index: {}]   ;;  %s1814_s2 = inlined_call_operand.vmem [shape: bf16[64,32], index: 2, kind: input, shape index: {}]   ;;  %s1815_s3 = inlined_call_operand.vmem [shape: f32[1,32], index: 3, kind: input, shape index: {}]   ;;  %s1816_s4 = inlined_call_operand.vmem [shape: f32[32,32], index: 4, kind: input, shape index: {}]   ;;  %s1817_s5 = inlined_call_operand.vmem [shape: f32[1,32], index: 5, kind: input, shape index: {}]   ;;  %s1818_s6 = inlined_call_operand.vmem [shape: bf16[64,32], index: 6, kind: input, shape index: {}]   ;;  %s1819_s7 = inlined_call_operand.vmem [shape: f32[1,32], index: 7, kind: input, shape index: {}]   ;;  %s1820_s8 = inlined_call_operand.vmem [shape: f32[32,32], index: 8, kind: input, shape index: {}]   ;;  %s1821_s9 = inlined_call_operand.vmem [shape: f32[1,32], index: 9, kind: input, shape index: {}]   ;;  %s1822_s10 = inlined_call_operand.hbm [shape: s32[2,1,128], index: 10, kind: output, shape index: {}]  }
   0x1   :  { %17 = vsyncpa [#allocation3 + $0x1], 0  ;;  %s1529_s13 = smov 0   ;;  %s1531_s14 = smov 0  }
   0x2   :  { %s1533_s15 = smov 0   ;;  %s1535_s16 = smov 0  }
   0x3 LB: > { %s1550_s17 = sadd.s32 4294967295, %s1469_s16   ;;  %s1246_s18 = sadd.s32 4294967294, %s1469_s16   ;;  %s1469_s16 = sphi %s1535_s16, %s1828_s16   ;;  %s1465_s15 = sphi %s1533_s15, %s1827_s15   ;;  %s1461_s14 = sphi %s1531_s14, %s1826_s14   ;;  %s1457_s13 = sphi %s1529_s13, %s1825_s13  }
   0x4   : > { %s1554_s19 = sadd.s32 1, %s1469_s16   ;;  %s250_s20 = sadd.s32 1, %s1465_s15 }
   0x5   : > { %s247_s21 = ssub.s32 %s1469_s16, %s1554_s19  ;;  %p260_p0 = scmp.ne.s32.totalorder %s1465_s15, %s1461_s14 }
   0x6   : > { %p248_p1 = scmp.eq.s32.totalorder %s247_s21, 0  ;;  %p261_p2 = scmp.eq.s32.totalorder %s1550_s17, 1 }
   0x7   : > { %p266_p3 = scmp.ne.s32.totalorder %s1461_s14, %s1457_s13  ;;  %p267_p4 = scmp.eq.s32.totalorder %s1246_s18, 1 }
   0x8   : > { %s1565_s22 = scalar_select %p248_p1, %s1465_s15, %s250_s20  }
   0x9   : > { %p1567_p5 = por %p261_p2, %p260_p0  ;;  %p1571_p6 = por %p267_p4, %p266_p3 }
   0xa   : > { %p1249_p7 = scmp.ge.s32.totalorder %s1469_s16, 1  ;;  %p325_p8 = scmp.lt.s32.totalorder %s1469_s16, 3 }
   0xc   : > { %p326_p9 = pnand %p1249_p7, %p325_p8 }
   0xd   : > { %p367_p10 = scmp.lt.s32.totalorder (!%p326_p9), %s1550_s17, 1  ;;  %s365_s29 = sand.u32 (!%p326_p9), 1, %s1461_s14  }
   0xe   : > { %329 = sbr.rel (%p326_p9) target bundleno = 2819 (0xb03), region = 60  ;;  %s366_s11 = scalar_lea.vmem (!%p326_p9), [#allocation2], %s365_s29 }
   0xf   : > { %s1179_s12 = sshll.u32 (!%p326_p9), %s366_s11, 4  ;;  %s1167_s25 = scalar_lea.sflag (!%p326_p9), [#allocation3], %s365_s29  ;;  %s1180_s12 = int_to_ptr.vmem [resolvable:$true] %s1179_s12 }
  0x10   : > { %s1409_s26 = scalar_lea.vmem (!%p326_p9), %s1180_s12, 16 }
  0x11   : > { %p1410_p11 = scmp.ne.s32.totalorder (!%p326_p9), %s1180_s12, %s1409_s26 }
  0x13   : > { %v1471_v0 = vmov 0.0   ;;  %v1401_v1 = vld [vmem:[%s1814_s2 + $0x18] sm:$0xff]   ;;  %s368_s27 = scalar_select %p367_p10, %s1550_s17, 1  ;;  %v1402_v2 = vld [vmem:[%s1814_s2 + $0x10] sm:$0xff]   ;;  %v1403_v4 = vld [vmem:[%s1814_s2 + $0x8] sm:$0xff]   ;;  %vm1472_vm0 = vmmov 0  }
  0x14   : > { %1307 = vmatprep.subr.bf16.mxu0 %v1471_v0  ;;  %1315 = vmatprep.mubr.msk.bf16.mxu0 %vm1472_vm0, %v1471_v0  ;;  %v1404_v6 = vld [vmem:[%s1814_s2] sm:$0xff]   ;;  %vm503_vm1 = vcmask 523264   ;;  %v470_v24 = vld [vmem:[%s1816_s4 + $0x18] sm:$0xff]  ;;  %v469_v25 = vld [vmem:[%s1816_s4 + $0x10] sm:$0xff]  ;;  %vm556_vm2 = vcmask 261120   ;;  %vm912_vm3 = vcmask 97280   ;;  %p1411_p12 = pnand %p1410_p11, %p1567_p5 }
  0x15   : > { %1308 = vmatpush3.bf16.msra.mxu0 %v1401_v1  ;;  %s1279_s30 = sshll.u32 %s368_s27, 6  ;;  %1319 = vmatprep.subr.mxu1 %v470_v24  ;;  %v468_v26 = vld [vmem:[%s1816_s4 + $0x8] sm:$0xff]  ;;  %v467_v27 = vld [vmem:[%s1816_s4] sm:$0xff]  ;;  %v1405_v36 = vld [vmem:[%s1818_s6 + $0x18] sm:$0xff]  }
  0x16   : > { %1309 = vmatprep.subr.bf16.mxu0 %v1471_v0  ;;  %s1590_s18 = scalar_lea.vmem %s1812_s0, %s1279_s30  ;;  %s1603_s27 = scalar_lea.vmem %s1813_s1, %s1279_s30  ;;  %1320 = vmatpush3.msra.mxu1 %v470_v24  ;;  %v1254_v28 = vld [vmem:[%s1815_s3] ss:$0 sm:$0xff]  ;;  %v1406_v38 = vld [vmem:[%s1818_s6 + $0x10] sm:$0xff]   ;;  %v1407_v40 = vld [vmem:[%s1818_s6 + $0x8] sm:$0xff]  }
  0x17   : > { %v378_v3 = vld [vmem:[%s1590_s18] sm:$0xff]  ;;  %v379_v5 = vld [vmem:[%s1590_s18 + $0x8] sm:$0xff]  ;;  %v380_v8 = vld [vmem:[%s1590_s18 + $0x10] sm:$0xff]  ;;  %1321 = vmatprep.subr.mxu1 %v469_v25  ;;  %s1276_s30 = sshll.u32 %s1550_s17, 4  ;;  %p1412_p13 = pneg %p1411_p12 }
  0x18   : > { %386 = vxpose.xlu0.b32.start [1/8] (short) (narrow) %v378_v3, 16  ;;  %v418_v7 = vld [vmem:[%s1603_s27] sm:$0xff]  ;;  %v419_v9 = vld [vmem:[%s1603_s27 + $0x8] sm:$0xff]  ;;  %v381_v10 = vld [vmem:[%s1590_s18 + $0x18] sm:$0xff]  ;;  %1322 = vmatpush3.msra.mxu1 %v469_v25  ;;  %s1776_s21 = scalar_lea.hbm %s1822_s10, %s1276_s30  ;;  %s1473_s17 = smov [#allocation2]  }
  0x19   : > { %1310 = vmatpush3.bf16.msra.mxu0 %v1402_v2  ;;  %426 = vxpose.xlu1.b32.start [1/8] (short) (narrow) %v418_v7, 16  ;;  %v420_v11 = vld [vmem:[%s1603_s27 + $0x10] sm:$0xff]  ;;  %v382_v12 = vld [vmem:[%s1590_s18 + $0x20] sm:$0xff]  ;;  %v421_v13 = vld [vmem:[%s1603_s27 + $0x18] sm:$0xff]  ;;  %v903_v7 = vlaneseq }
  0x1a   : > { %1311 = vmatprep.subr.bf16.mxu0 %v1471_v0  ;;  %v383_v14 = vld [vmem:[%s1590_s18 + $0x28] sm:$0xff]  ;;  %v422_v15 = vld [vmem:[%s1603_s27 + $0x20] sm:$0xff]  ;;  %v384_v16 = vld [vmem:[%s1590_s18 + $0x30] sm:$0xff]  ;;  %1323 = vmatprep.subr.mxu1 %v468_v26 }
  0x1b   : > { %v423_v17 = vld [vmem:[%s1603_s27 + $0x28] sm:$0xff]  ;;  %v385_v18 = vld [vmem:[%s1590_s18 + $0x38] sm:$0xff]  ;;  %v424_v19 = vld [vmem:[%s1603_s27 + $0x30] sm:$0xff]  ;;  %1324 = vmatpush3.msra.mxu1 %v468_v26 }
  0x1c   : > { %387 = vxpose.xlu0.b32.cont [2/8] (short) (narrow) %v379_v5, 16  ;;  %v425_v20 = vld [vmem:[%s1603_s27 + $0x38] sm:$0xff]  ;;  %1325 = vmatprep.subr.mxu1 %v467_v27  ;;  %v1408_v41 = vld [vmem:[%s1818_s6] sm:$0xff]   ;;  %v649_v45 = vld [vmem:[%s1820_s8 + $0x10] sm:$0xff]  ;;  %s1413_s27 = sshll.u32 %s1473_s17, 4  ;;  %s1414_s27 = int_to_ptr.vmem [resolvable:$false] %s1413_s27 }
  0x1d   : > { %1312 = vmatpush3.bf16.msra.mxu0 %v1403_v4  ;;  %427 = vxpose.xlu1.b32.cont [2/8] (short) (narrow) %v419_v9, 16  ;;  %v650_v44 = vld [vmem:[%s1820_s8 + $0x18] sm:$0xff]  ;;  %v648_v46 = vld [vmem:[%s1820_s8 + $0x8] sm:$0xff]  ;;  %v647_v47 = vld [vmem:[%s1820_s8] sm:$0xff]  ;;  %s1415_s28 = scalar_lea.vmem %s1414_s27, 32  ;;  %p1416_p0 = scmp.lt.s32.totalorder %s1180_s12, %s1414_s27 }
  0x1e   : > { %1313 = vmatprep.subr.bf16.mxu0 %v1471_v0  ;;  %1326 = vmatpush3.msra.mxu1 %v467_v27  ;;  %v1260_v48 = vld [vmem:[%s1817_s5] ss:$0 sm:$0xff]  ;;  %p1417_p1 = scmp.lt.s32.totalorder %s1415_s28, %s1409_s26 }
  0x1f   : > { %1330 = vmatprep.subr.bf16.mxu1 %v1471_v0  ;;  %v1263_v52 = vld [vmem:[%s1819_s7] ss:$0 sm:$0xff] }
  0x20   : > { %388 = vxpose.xlu0.b32.cont [3/8] (short) (narrow) %v380_v8, 16  ;;  %v1269_v62 = vld [vmem:[%s1821_s9] ss:$0 sm:$0xff]  ;;  %p1418_p2 = por %p1417_p1, %p1416_p0 }
  0x21   : > { %1314 = vmatpush3.bf16.msra.mxu0 %v1404_v6  ;;  %428 = vxpose.xlu1.b32.cont [3/8] (short) (narrow) %v420_v11, 16 }
  0x22   : > { %1342 = vmatprep.subr.mxu0 %v650_v44  ;;  %p1419_p3 = pnand %p1418_p2, %p1412_p13 }
  0x24   : > { %389 = vxpose.xlu0.b32.cont [4/8] (short) (narrow) %v381_v10, 16  ;;  %v904_v10 = vshrl.u32 %v903_v7, 7 }
  0x25   : > { %429 = vxpose.xlu1.b32.cont [4/8] (short) (narrow) %v421_v13, 16 }
  0x26   : > { %v905_v13 = vadd.s32 8, %v904_v10 }
  0x28   : > { %390 = vxpose.xlu0.b32.cont [5/8] (short) (narrow) %v382_v12, 16 }
  0x29   : > { %430 = vxpose.xlu1.b32.cont [5/8] (short) (narrow) %v422_v15, 16 }
  0x2c   : > { %391 = vxpose.xlu0.b32.cont [6/8] (short) (narrow) %v383_v14, 16 }
  0x2d   : > { %431 = vxpose.xlu1.b32.cont [6/8] (short) (narrow) %v423_v17, 16  ;;  %v908_v17 = vmul.u32 12, %v904_v10 }
  0x30   : > { %392 = vxpose.xlu0.b32.cont [7/8] (short) (narrow) %v384_v16, 16  ;;  %v1697_v16 = vand.u32 127, %v903_v7 }
  0x31   : > { %432 = vxpose.xlu1.b32.cont [7/8] (short) (narrow) %v424_v19, 16 }
  0x34   : > { %393 = vxpose.xlu0.b32.end [8/8] (short) (narrow) %v385_v18, 16  ;;  %v909_v18 = vmul.u32 12, %v905_v13 }
  0x35   : > { %433 = vxpose.xlu1.b32.end [8/8] (short) (narrow) %v425_v20, 16 }
  0x94   : > { %v402_v21 = vpop.trf.xlu0 }
  0x95   : > { %v442_v39 = vpop.trf.xlu1 }
  0x98   : > { %v403_v22 = vpop.trf.xlu0 }
  0x99   : > { %v472_v23 = vpack.c.bf16 %v403_v22, %v402_v21  ;;  %v443_v42 = vpop.trf.xlu1  ;;  %v1700_v21 = vadd.s32 %v908_v17, %v1697_v16  ;;  %v1703_v22 = vadd.s32 %v909_v18, %v1697_v16 }
  0x9a   : > { %v652_v43 = vpack.c.bf16 %v443_v42, %v442_v39 }
  0x9b   : > { %1316 = vmatmul.mubr.msk.bf16.vlgmr.msra.gmra.mxu0 %vm503_vm1, %v472_v23 }
  0x9c   : > { %1343 = vmatpush3.msra.mxu0 %v650_v44 }
  0x9d   : > { %1344 = vmatprep.subr.mxu0 %v649_v45 }
  0x9e   : > { %1345 = vmatpush3.msra.mxu0 %v649_v45 }
  0x9f   : > { %1346 = vmatprep.subr.mxu0 %v648_v46 }
  0xa0   : > { %1347 = vmatpush3.msra.mxu0 %v648_v46 }
  0xa1   : > { %1348 = vmatprep.subr.mxu0 %v647_v47 }
  0xa2   : > { %1349 = vmatpush3.msra.mxu0 %v647_v47 }
 0x15b   : > { %v541_v29 = vpop.f32.mrf.mxu0 }
 0x15c   : > { %v542_v30 = vadd.f32 %v1254_v28, %v541_v29 }
 0x15d   : > { %v1317_v31 = vpop.f32.mrf.mxu0 }
 0x15e   : > { %v548_v32 = vmax.f32 %v542_v30, 0.0 }
 0x15f   : > { %v544_v33 = vpop.f32.mrf.mxu0 }
 0x160   : > { %v545_v34 = vadd.f32 %v1254_v28, %v544_v33  ;;  %1327 = vmatprep.mubr.msk.f32.mxu1 %vm556_vm2, %v548_v32 }
 0x161   : > { %v1318_v35 = vpop.f32.mrf.mxu0 }
 0x162   : > { %v549_v37 = vmax.f32 %v545_v34, 0.0 }
 0x164   : > { %1328 = vmatmul.mubr.msk.f32.vlgmr.msra.gmra.mxu1 %vm556_vm2, %v549_v37 }
 0x165   : > { %1331 = vmatpush3.bf16.msra.mxu1 %v1405_v36  ;;  %1338 = vmatprep.mubr.msk.bf16.mxu1 %vm1472_vm0, %v1471_v0 }
 0x166   : > { %1332 = vmatprep.subr.bf16.mxu1 %v1471_v0 }
 0x169   : > { %1333 = vmatpush3.bf16.msra.mxu1 %v1406_v38 }
 0x16a   : > { %1334 = vmatprep.subr.bf16.mxu1 %v1471_v0 }
 0x16d   : > { %1335 = vmatpush3.bf16.msra.mxu1 %v1407_v40 }
 0x16e   : > { %1336 = vmatprep.subr.bf16.mxu1 %v1471_v0 }
 0x171   : > { %1337 = vmatpush3.bf16.msra.mxu1 %v1408_v41 }
 0x174   : > { %1339 = vmatmul.mubr.msk.bf16.vlgmr.msra.gmra.mxu1 %vm503_vm1, %v652_v43 }
 0x224   : > { %v1329_v49 = vpop.f32.mrf.mxu1 }
 0x225   : > { %v635_v50 = vadd.f32 %v1329_v49, %v1260_v48 }
 0x226   : > { %v629_v51 = vpop.f32.mrf.mxu1 }
 0x227   : > { %v630_v61 = vadd.f32 %v1260_v48, %v629_v51 }
 0x234   : > { %v720_v53 = vpop.f32.mrf.mxu1 }
 0x235   : > { %v721_v54 = vadd.f32 %v1263_v52, %v720_v53 }
 0x236   : > { %v1340_v55 = vpop.f32.mrf.mxu1 }
 0x237   : > { %v727_v56 = vmax.f32 %v721_v54, 0.0 }
 0x238   : > { %v723_v57 = vpop.f32.mrf.mxu1 }
 0x239   : > { %v724_v58 = vadd.f32 %v1263_v52, %v723_v57  ;;  %1350 = vmatprep.mubr.msk.f32.mxu0 %vm556_vm2, %v727_v56 }
 0x23a   : > { %v1341_v59 = vpop.f32.mrf.mxu1 }
 0x23b   : > { %v728_v60 = vmax.f32 %v724_v58, 0.0 }
 0x23d   : > { %1351 = vmatmul.mubr.msk.f32.vlgmr.msra.gmra.mxu0 %vm556_vm2, %v728_v60 }
 0x23e   : > { %1357 = vmatprep.mubr.msk.f32.mxu0 %vm556_vm2, %v630_v61 }
 0x2fd   : > { %v1352_v63 = vpop.f32.mrf.mxu0 }
 0x2fe   : > { %v813_v0 = vadd.f32 %v1352_v63, %v1269_v62 }
 0x2ff   : > { %v807_v1 = vpop.f32.mrf.mxu0 }
 0x300   : > { %v808_v2 = vadd.f32 %v1269_v62, %v807_v1  ;;  %1353 = vmatprep.subr.msk.mxu0 %vm556_vm2, %v813_v0 }
 0x301   : > { %1354 = vmatpush3.xpose.msk.msra.mxu0 %vm556_vm2, %v813_v0 }
 0x302   : > { %1355 = vmatprep.subr.msk.mxu0 %vm556_vm2, %v808_v2 }
 0x305   : > { %1356 = vmatpush3.xpose.msk.msra.mxu0 %vm556_vm2, %v808_v2 }
 0x308   : > { %1358 = vmatmul.mubr.msk.f32.vlgmr.msra.gmra.mxu0 %vm556_vm2, %v635_v50 }
 0x3c8   : > { %v1689_v3 = vpop.f32.mrf.mxu0 }
 0x3c9   : > { %v916_v4 = vsel %vm912_vm3, %v1689_v3, -inf }
 0x3ca   : > { %917 = vmax.xlane.f32.xlu1 %v916_v4  ;;  %v1693_v5 = vpop.f32.mrf.mxu0 }
 0x3cb   : > { %v913_v6 = vsel %vm912_vm3, %v1693_v5, -inf }
 0x3cc   : > { %914 = vmax.xlane.f32.xlu0 %v913_v6 }
 0x453   : > { %v918_v8 = vpop.xlane.xlu1 %917 }
 0x455   : > { %v915_v9 = vpop.xlane.xlu0 %914 }
 0x456   : > { %v919_v11 = vmax.f32 %v915_v9, %v918_v8 }
 0x458   : > { %v920_v12 = vrot.slane %v919_v11, 4 }
 0x45a   : > { %v921_v14 = vmax.f32 %v919_v11, %v920_v12 }
 0x45c   : > { %v922_v15 = vrot.slane %v921_v14, 2 }
 0x45e   : > { %v923_v19 = vmax.f32 %v921_v14, %v922_v15 }
 0x460   : > { %v924_v20 = vrot.slane %v923_v19, 1 }
 0x462   : > { %v925_v23 = vmax.f32 %v923_v19, %v924_v20 }
 0x464   : > { %vm926_vm4 = vcmp.eq.f32.partialorder %v1693_v5, %v925_v23  ;;  %vm927_vm5 = vcmp.eq.f32.partialorder %v1689_v3, %v925_v23 }
 0x465   : > { %v928_v24 = vsel %vm926_vm4, %v1700_v21, 192  ;;  %v929_v25 = vsel %vm927_vm5, %v1703_v22, 192 }
 0x466   : > { %v930_v26 = vsel %vm912_vm3, %v928_v24, 2147483647  ;;  %v945_v27 = vsel %vm912_vm3, %v929_v25, 2147483647 }
 0x467   : > { %v932_v28 = vshra.s32 %v930_v26, 16  ;;  %v947_v30 = vshra.s32 %v945_v27, 16  ;;  %v931_v32 = vand.u32 65535, %v930_v26  ;;  %v946_v35 = vand.u32 65535, %v945_v27 }
 0x469   : > { %v934_v29 = vcvt.s32.f32 %v932_v28  ;;  %v949_v31 = vcvt.s32.f32 %v947_v30  ;;  %v933_v34 = vcvt.s32.f32 %v931_v32  ;;  %v948_v38 = vcvt.s32.f32 %v946_v35 }
 0x46b   : > { %935 = vmin.xlane.f32.xlu1 %v934_v29 }
 0x46f   : > { %950 = vmin.xlane.f32.xlu1 %v949_v31 }
 0x4f4   : > { %v936_v33 = vpop.xlane.xlu1 %935 }
 0x4f5   : > { %vm937_vm6 = vcmp.eq.f32.partialorder %v934_v29, %v936_v33  ;;  %v942_v41 = vcvt.f32.s32 %v936_v33 }
 0x4f6   : > { %v938_v36 = vsel %vm937_vm6, %v933_v34, inf  ;;  %vm971_vm6 = vcmp.eq.s32.totalorder %v1697_v16, 0 }
 0x4f7   : > { %939 = vmin.xlane.f32.xlu0 %v938_v36  ;;  %v943_v45 = vshll.u32 %v942_v41, 16 }
 0x4f8   : > { %v951_v37 = vpop.xlane.xlu1 %950 }
 0x4f9   : > { %vm952_vm7 = vcmp.eq.f32.partialorder %v949_v31, %v951_v37  ;;  %v957_v42 = vcvt.f32.s32 %v951_v37 }
 0x4fa   : > { %v953_v39 = vsel %vm952_vm7, %v948_v38, inf  ;;  %vm1035_vm7 = vcmp.eq.s32.totalorder %v1697_v16, 1 }
 0x4fb   : > { %954 = vmin.xlane.f32.xlu1 %v953_v39  ;;  %v958_v46 = vshll.u32 %v957_v42, 16 }
 0x580   : > { %v940_v40 = vpop.xlane.xlu0 %939 }
 0x581   : > { %v941_v43 = vcvt.f32.s32 %v940_v40 }
 0x583   : > { %v944_v48 = vadd.s32 %v943_v45, %v941_v43 }
 0x584   : > { %v955_v44 = vpop.xlane.xlu1 %954 }
 0x585   : > { %v956_v47 = vcvt.f32.s32 %v955_v44 }
 0x587   : > { %v959_v49 = vadd.s32 %v958_v46, %v956_v47 }
 0x589   : > { %vm960_vm8 = vcmp.lt.s32.totalorder %v944_v48, %v959_v49 }
 0x58a   : > { %v961_v50 = vsel %vm960_vm8, %v944_v48, %v959_v49 }
 0x58b   : > { %v962_v51 = vrot.slane %v961_v50, 4 }
 0x58d   : > { %vm963_vm9 = vcmp.lt.s32.totalorder %v961_v50, %v962_v51 }
 0x58e   : > { %v964_v52 = vsel %vm963_vm9, %v961_v50, %v962_v51 }
 0x58f   : > { %v965_v53 = vrot.slane %v964_v52, 2 }
 0x591   : > { %vm966_vm10 = vcmp.lt.s32.totalorder %v964_v52, %v965_v53 }
 0x592   : > { %v967_v54 = vsel %vm966_vm10, %v964_v52, %v965_v53 }
 0x593   : > { %v968_v55 = vrot.slane %v967_v54, 1 }
 0x595   : > { %vm969_vm11 = vcmp.lt.s32.totalorder %v967_v54, %v968_v55 }
 0x596   : > { %v1711_v56 = vsel %vm969_vm11, %v967_v54, %v968_v55 }
 0x597   : > { %vm974_vm12 = vcmp.eq.s32.totalorder %v1703_v22, %v1711_v56  ;;  %vm973_vm13 = vcmp.eq.s32.totalorder %v1700_v21, %v1711_v56  ;;  %v972_v41 = vsel %vm971_vm6, %v1711_v56, 0 }
 0x598   : > { %v1718_v57 = vsel %vm974_vm12, -inf, %v1689_v3  ;;  %v1721_v58 = vsel %vm973_vm13, -inf, %v1693_v5 }
 0x599   : > { %v980_v59 = vsel %vm912_vm3, %v1718_v57, -inf  ;;  %v977_v60 = vsel %vm912_vm3, %v1721_v58, -inf }
 0x59a   : > { %981 = vmax.xlane.f32.xlu1 %v980_v59  ;;  %978 = vmax.xlane.f32.xlu0 %v977_v60 }
 0x623   : > { %v982_v61 = vpop.xlane.xlu1 %981  ;;  %v979_v62 = vpop.xlane.xlu0 %978 }
 0x624   : > { %v983_v63 = vmax.f32 %v979_v62, %v982_v61 }
 0x626   : > { %v984_v0 = vrot.slane %v983_v63, 4 }
 0x628   : > { %v985_v1 = vmax.f32 %v983_v63, %v984_v0 }
 0x62a   : > { %v986_v2 = vrot.slane %v985_v1, 2 }
 0x62c   : > { %v987_v4 = vmax.f32 %v985_v1, %v986_v2 }
 0x62e   : > { %v988_v3 = vrot.slane %v987_v4, 1 }
 0x630   : > { %v989_v6 = vmax.f32 %v987_v4, %v988_v3 }
 0x632   : > { %vm991_vm14 = vcmp.eq.f32.partialorder %v1718_v57, %v989_v6  ;;  %vm990_vm15 = vcmp.eq.f32.partialorder %v1721_v58, %v989_v6 }
 0x633   : > { %v993_v5 = vsel %vm991_vm14, %v1703_v22, 192  ;;  %v992_v7 = vsel %vm990_vm15, %v1700_v21, 192 }
 0x634   : > { %v1009_v8 = vsel %vm912_vm3, %v993_v5, 2147483647  ;;  %v994_v9 = vsel %vm912_vm3, %v992_v7, 2147483647 }
 0x635   : > { %v1011_v10 = vshra.s32 %v1009_v8, 16  ;;  %v996_v11 = vshra.s32 %v994_v9, 16  ;;  %v1010_v14 = vand.u32 65535, %v1009_v8  ;;  %v995_v15 = vand.u32 65535, %v994_v9 }
 0x637   : > { %v1013_v12 = vcvt.s32.f32 %v1011_v10  ;;  %v998_v13 = vcvt.s32.f32 %v996_v11  ;;  %v1012_v19 = vcvt.s32.f32 %v1010_v14  ;;  %v997_v20 = vcvt.s32.f32 %v995_v15 }
 0x639   : > { %1014 = vmin.xlane.f32.xlu1 %v1013_v12  ;;  %999 = vmin.xlane.f32.xlu0 %v998_v13 }
 0x6c2   : > { %v1015_v17 = vpop.xlane.xlu1 %1014  ;;  %v1000_v18 = vpop.xlane.xlu0 %999 }
 0x6c3   : > { %vm1016_vm0 = vcmp.eq.f32.partialorder %v1013_v12, %v1015_v17  ;;  %vm1001_vm1 = vcmp.eq.f32.partialorder %v998_v13, %v1000_v18  ;;  %v1021_v25 = vcvt.f32.s32 %v1015_v17  ;;  %v1006_v26 = vcvt.f32.s32 %v1000_v18 }
 0x6c4   : > { %v1017_v23 = vsel %vm1016_vm0, %v1012_v19, inf  ;;  %v1002_v24 = vsel %vm1001_vm1, %v997_v20, inf }
 0x6c5   : > { %1018 = vmin.xlane.f32.xlu1 %v1017_v23  ;;  %1003 = vmin.xlane.f32.xlu0 %v1002_v24  ;;  %v1022_v29 = vshll.u32 %v1021_v25, 16  ;;  %v1007_v30 = vshll.u32 %v1006_v26, 16 }
 0x74e   : > { %v1019_v27 = vpop.xlane.xlu1 %1018  ;;  %v1004_v28 = vpop.xlane.xlu0 %1003 }
 0x74f   : > { %v1020_v31 = vcvt.f32.s32 %v1019_v27  ;;  %v1005_v32 = vcvt.f32.s32 %v1004_v28 }
 0x751   : > { %v1023_v33 = vadd.s32 %v1022_v29, %v1020_v31  ;;  %v1008_v34 = vadd.s32 %v1007_v30, %v1005_v32 }
 0x753   : > { %vm1024_vm2 = vcmp.lt.s32.totalorder %v1008_v34, %v1023_v33 }
 0x754   : > { %v1025_v35 = vsel %vm1024_vm2, %v1008_v34, %v1023_v33  ;;  %vm1099_vm2 = vcmp.eq.s32.totalorder %v1697_v16, 2 }
 0x755   : > { %v1026_v36 = vrot.slane %v1025_v35, 4 }
 0x757   : > { %vm1027_vm4 = vcmp.lt.s32.totalorder %v1025_v35, %v1026_v36 }
 0x758   : > { %v1028_v37 = vsel %vm1027_vm4, %v1025_v35, %v1026_v36 }
 0x759   : > { %v1029_v38 = vrot.slane %v1028_v37, 2 }
 0x75b   : > { %vm1030_vm5 = vcmp.lt.s32.totalorder %v1028_v37, %v1029_v38 }
 0x75c   : > { %v1031_v39 = vsel %vm1030_vm5, %v1028_v37, %v1029_v38 }
 0x75d   : > { %v1032_v40 = vrot.slane %v1031_v39, 1 }
 0x75f   : > { %vm1033_vm8 = vcmp.lt.s32.totalorder %v1031_v39, %v1032_v40 }
 0x760   : > { %v1034_v42 = vsel %vm1033_vm8, %v1031_v39, %v1032_v40 }
 0x761   : > { %vm1038_vm9 = vcmp.eq.s32.totalorder %v1703_v22, %v1034_v42  ;;  %v1737_v43 = vsel %vm1035_vm7, %v1034_v42, %v972_v41  ;;  %vm1037_vm10 = vcmp.eq.s32.totalorder %v1700_v21, %v1034_v42 }
 0x762   : > { %v1741_v44 = vsel %vm1038_vm9, -inf, %v1718_v57  ;;  %v1744_v45 = vsel %vm1037_vm10, -inf, %v1721_v58 }
 0x763   : > { %v1044_v46 = vsel %vm912_vm3, %v1741_v44, -inf  ;;  %v1041_v47 = vsel %vm912_vm3, %v1744_v45, -inf }
 0x764   : > { %1045 = vmax.xlane.f32.xlu1 %v1044_v46  ;;  %1042 = vmax.xlane.f32.xlu0 %v1041_v47 }
 0x7ed   : > { %v1046_v48 = vpop.xlane.xlu1 %1045  ;;  %v1043_v49 = vpop.xlane.xlu0 %1042 }
 0x7ee   : > { %v1047_v50 = vmax.f32 %v1043_v49, %v1046_v48 }
 0x7f0   : > { %v1048_v51 = vrot.slane %v1047_v50, 4 }
 0x7f2   : > { %v1049_v52 = vmax.f32 %v1047_v50, %v1048_v51 }
 0x7f4   : > { %v1050_v53 = vrot.slane %v1049_v52, 2 }
 0x7f6   : > { %v1051_v54 = vmax.f32 %v1049_v52, %v1050_v53 }
 0x7f8   : > { %v1052_v55 = vrot.slane %v1051_v54, 1 }
 0x7fa   : > { %v1053_v56 = vmax.f32 %v1051_v54, %v1052_v55 }
 0x7fc   : > { %vm1055_vm11 = vcmp.eq.f32.partialorder %v1741_v44, %v1053_v56  ;;  %vm1054_vm12 = vcmp.eq.f32.partialorder %v1744_v45, %v1053_v56 }
 0x7fd   : > { %v1057_v57 = vsel %vm1055_vm11, %v1703_v22, 192  ;;  %v1056_v58 = vsel %vm1054_vm12, %v1700_v21, 192 }
 0x7fe   : > { %v1073_v59 = vsel %vm912_vm3, %v1057_v57, 2147483647  ;;  %v1058_v60 = vsel %vm912_vm3, %v1056_v58, 2147483647 }
 0x7ff   : > { %v1075_v61 = vshra.s32 %v1073_v59, 16  ;;  %v1060_v62 = vshra.s32 %v1058_v60, 16  ;;  %v1074_v1 = vand.u32 65535, %v1073_v59  ;;  %v1059_v2 = vand.u32 65535, %v1058_v60 }
 0x801   : > { %v1077_v63 = vcvt.s32.f32 %v1075_v61  ;;  %v1062_v0 = vcvt.s32.f32 %v1060_v62  ;;  %v1076_v6 = vcvt.s32.f32 %v1074_v1  ;;  %v1061_v5 = vcvt.s32.f32 %v1059_v2 }
 0x803   : > { %1078 = vmin.xlane.f32.xlu1 %v1077_v63  ;;  %1063 = vmin.xlane.f32.xlu0 %v1062_v0 }
 0x88c   : > { %v1079_v4 = vpop.xlane.xlu1 %1078  ;;  %v1064_v3 = vpop.xlane.xlu0 %1063 }
 0x88d   : > { %vm1080_vm13 = vcmp.eq.f32.partialorder %v1077_v63, %v1079_v4  ;;  %vm1065_vm14 = vcmp.eq.f32.partialorder %v1062_v0, %v1064_v3  ;;  %v1085_v9 = vcvt.f32.s32 %v1079_v4  ;;  %v1070_v10 = vcvt.f32.s32 %v1064_v3 }
 0x88e   : > { %v1081_v7 = vsel %vm1080_vm13, %v1076_v6, inf  ;;  %v1066_v8 = vsel %vm1065_vm14, %v1061_v5, inf  ;;  %vm1163_vm13 = vcmp.eq.s32.totalorder %v1697_v16, 3 }
 0x88f   : > { %1082 = vmin.xlane.f32.xlu1 %v1081_v7  ;;  %1067 = vmin.xlane.f32.xlu0 %v1066_v8  ;;  %v1086_v13 = vshll.u32 %v1085_v9, 16  ;;  %v1071_v14 = vshll.u32 %v1070_v10, 16 }
 0x918   : > { %v1083_v11 = vpop.xlane.xlu1 %1082  ;;  %v1068_v12 = vpop.xlane.xlu0 %1067 }
 0x919   : > { %v1084_v15 = vcvt.f32.s32 %v1083_v11  ;;  %v1069_v17 = vcvt.f32.s32 %v1068_v12 }
 0x91b   : > { %v1087_v18 = vadd.s32 %v1086_v13, %v1084_v15  ;;  %v1072_v19 = vadd.s32 %v1071_v14, %v1069_v17 }
 0x91d   : > { %vm1088_vm15 = vcmp.lt.s32.totalorder %v1072_v19, %v1087_v18 }
 0x91e   : > { %v1089_v20 = vsel %vm1088_vm15, %v1072_v19, %v1087_v18 }
 0x91f   : > { %v1090_v23 = vrot.slane %v1089_v20, 4 }
 0x921   : > { %vm1091_vm0 = vcmp.lt.s32.totalorder %v1089_v20, %v1090_v23 }
 0x922   : > { %v1092_v24 = vsel %vm1091_vm0, %v1089_v20, %v1090_v23 }
 0x923   : > { %v1093_v25 = vrot.slane %v1092_v24, 2 }
 0x925   : > { %vm1094_vm1 = vcmp.lt.s32.totalorder %v1092_v24, %v1093_v25 }
 0x926   : > { %v1095_v26 = vsel %vm1094_vm1, %v1092_v24, %v1093_v25 }
 0x927   : > { %v1096_v27 = vrot.slane %v1095_v26, 1 }
 0x929   : > { %vm1097_vm4 = vcmp.lt.s32.totalorder %v1095_v26, %v1096_v27 }
 0x92a   : > { %v1098_v28 = vsel %vm1097_vm4, %v1095_v26, %v1096_v27 }
 0x92b   : > { %vm1102_vm5 = vcmp.eq.s32.totalorder %v1703_v22, %v1098_v28  ;;  %vm1101_vm6 = vcmp.eq.s32.totalorder %v1700_v21, %v1098_v28  ;;  %v1760_v29 = vsel %vm1099_vm2, %v1098_v28, %v1737_v43 }
 0x92c   : > { %v1104_v30 = vsel %vm1102_vm5, -inf, %v1741_v44  ;;  %v1103_v31 = vsel %vm1101_vm6, -inf, %v1744_v45 }
 0x92d   : > { %v1108_v32 = vsel %vm912_vm3, %v1104_v30, -inf  ;;  %v1105_v33 = vsel %vm912_vm3, %v1103_v31, -inf }
 0x92e   : > { %1109 = vmax.xlane.f32.xlu1 %v1108_v32  ;;  %1106 = vmax.xlane.f32.xlu0 %v1105_v33 }
 0x9b7   : > { %v1110_v34 = vpop.xlane.xlu1 %1109  ;;  %v1107_v35 = vpop.xlane.xlu0 %1106 }
 0x9b8   : > { %v1111_v36 = vmax.f32 %v1107_v35, %v1110_v34 }
 0x9ba   : > { %v1112_v37 = vrot.slane %v1111_v36, 4 }
 0x9bc   : > { %v1113_v38 = vmax.f32 %v1111_v36, %v1112_v37 }
 0x9be   : > { %v1114_v39 = vrot.slane %v1113_v38, 2 }
 0x9c0   : > { %v1115_v40 = vmax.f32 %v1113_v38, %v1114_v39 }
 0x9c2   : > { %v1116_v41 = vrot.slane %v1115_v40, 1 }
 0x9c4   : > { %v1117_v42 = vmax.f32 %v1115_v40, %v1116_v41 }
 0x9c6   : > { %vm1119_vm7 = vcmp.eq.f32.partialorder %v1104_v30, %v1117_v42  ;;  %vm1118_vm8 = vcmp.eq.f32.partialorder %v1103_v31, %v1117_v42 }
 0x9c7   : > { %v1121_v43 = vsel %vm1119_vm7, %v1703_v22, 192  ;;  %v1120_v44 = vsel %vm1118_vm8, %v1700_v21, 192 }
 0x9c8   : > { %v1137_v45 = vsel %vm912_vm3, %v1121_v43, 2147483647  ;;  %v1122_v46 = vsel %vm912_vm3, %v1120_v44, 2147483647 }
 0x9c9   : > { %v1139_v47 = vshra.s32 %v1137_v45, 16  ;;  %v1124_v48 = vshra.s32 %v1122_v46, 16  ;;  %v1138_v51 = vand.u32 65535, %v1137_v45  ;;  %v1123_v52 = vand.u32 65535, %v1122_v46 }
 0x9cb   : > { %v1141_v49 = vcvt.s32.f32 %v1139_v47  ;;  %v1126_v50 = vcvt.s32.f32 %v1124_v48  ;;  %v1140_v55 = vcvt.s32.f32 %v1138_v51  ;;  %v1125_v56 = vcvt.s32.f32 %v1123_v52 }
 0x9cd   : > { %1142 = vmin.xlane.f32.xlu1 %v1141_v49  ;;  %1127 = vmin.xlane.f32.xlu0 %v1126_v50 }
 0xa56   : > { %v1143_v53 = vpop.xlane.xlu1 %1142  ;;  %v1128_v54 = vpop.xlane.xlu0 %1127 }
 0xa57   : > { %vm1144_vm9 = vcmp.eq.f32.partialorder %v1141_v49, %v1143_v53  ;;  %vm1129_vm10 = vcmp.eq.f32.partialorder %v1126_v50, %v1128_v54  ;;  %v1149_v57 = vcvt.f32.s32 %v1143_v53  ;;  %v1134_v58 = vcvt.f32.s32 %v1128_v54 }
 0xa58   : > { %v1145_v22 = vsel %vm1144_vm9, %v1140_v55, inf  ;;  %v1130_v21 = vsel %vm1129_vm10, %v1125_v56, inf }
 0xa59   : > { %1146 = vmin.xlane.f32.xlu1 %v1145_v22  ;;  %1131 = vmin.xlane.f32.xlu0 %v1130_v21  ;;  %v1150_v61 = vshll.u32 %v1149_v57, 16  ;;  %v1135_v62 = vshll.u32 %v1134_v58, 16 }
 0xae2   : > { %v1147_v59 = vpop.xlane.xlu1 %1146  ;;  %v1132_v60 = vpop.xlane.xlu0 %1131 }
 0xae3   : > { %v1148_v63 = vcvt.f32.s32 %v1147_v59  ;;  %v1133_v0 = vcvt.f32.s32 %v1132_v60 }
 0xae5   : > { %v1151_v1 = vadd.s32 %v1150_v61, %v1148_v63  ;;  %v1136_v2 = vadd.s32 %v1135_v62, %v1133_v0 }
 0xae7   : > { %vm1152_vm3 = vcmp.lt.s32.totalorder %v1136_v2, %v1151_v1 }
 0xae8   : > { %v1153_v4 = vsel %vm1152_vm3, %v1136_v2, %v1151_v1 }
 0xae9   : > { %v1154_v3 = vrot.slane %v1153_v4, 4 }
 0xaeb   : > { %vm1155_vm11 = vcmp.lt.s32.totalorder %v1153_v4, %v1154_v3 }
 0xaec   : > { %v1156_v6 = vsel %vm1155_vm11, %v1153_v4, %v1154_v3 }
 0xaed   : > { %v1157_v5 = vrot.slane %v1156_v6, 2 }
 0xaef   : > { %vm1158_vm12 = vcmp.lt.s32.totalorder %v1156_v6, %v1157_v5 }
 0xaf0   : > { %v1159_v7 = vsel %vm1158_vm12, %v1156_v6, %v1157_v5 }
 0xaf1   : > { %v1160_v8 = vrot.slane %v1159_v7, 1 }
 0xaf3   : > { %vm1161_vm14 = vcmp.lt.s32.totalorder %v1159_v7, %v1160_v8 }
 0xaf4   : > { %v1162_v9 = vsel %vm1161_vm14, %v1159_v7, %v1160_v8 }
 0xaf5   : > { %v1164_v10 = vsel %vm1163_vm13, %v1162_v9, %v1760_v29 }
 0xaf6   : > { %1165 = vst [vmem:[%s366_s11] sm:$0x1] %v1164_v10 }
 0xaf7   : > { %1422 = shalt.err (!%p1419_p3)
}
 0xaf8   : > { %s1423_s30 = scalar_lea.hbm %s1776_s21, 16  ;;  %s1427_s18 = scalar_lea.hbm %s1822_s10, 32 }
 0xaf9   : > { %p1424_p4 = scmp.ne.s32.totalorder %s1776_s21, %s1423_s30  ;;  %p1428_p9 = scmp.lt.s32.totalorder %s1776_s21, %s1822_s10 }
 0xafa   : > { %p1429_p10 = scmp.lt.s32.totalorder %s1427_s18, %s1423_s30 }
 0xafb   : > { %p1425_p7 = pnand %p1424_p4, %p1567_p5 }
 0xafc   : > { %p1430_p11 = por %p1429_p10, %p1428_p9 }
 0xafd   : > { %p1426_p8 = pneg %p1425_p7 }
 0xaff   : > { %p1431_p12 = pnand %p1430_p11, %p1426_p8 }
 0xb01   : > { %1434 = shalt.err (!%p1431_p12)
}
 0xb02   : > { %1360 = dma.vmem_to_hbm [thread:$0]  (%p1567_p5), %s1180_s12, 16, %s1776_s21, %s1167_s25  }
 0xb03 PF: > { %p1366_p13 = scmp.ge.s32.totalorder %s1469_s16, 2  ;;  %s1191_s26 = sand.u32 1, %s1457_s13  }
 0xb04   : > { %s1192_s27 = scalar_lea.sflag [#allocation3], %s1191_s26 }
 0xb05   : > { %p1363_p0 = pnand %p1366_p13, %p1571_p6 }
 0xb07   : > { %p1364_p1 = pneg %p1363_p0 }
 0xb09   : > { %1452 = dma.done.wait (%p1364_p1), %s1192_s27, 16  }
 0xb0a   : > { %1454 = vsyncadd (%p1364_p1), %s1192_s27, 4294967280  ;;  %p20_p2 = scmp.ge.s32.totalorder %s1554_s19, 4   ;;  %s1825_s13 = smov %s1461_s14 }
 0xb0b   : > { %s1826_s14 = smov %s1465_s15  ;;  %s1827_s15 = smov %s1565_s22 }
 0xb0c   : > { %s1828_s16 = smov %s1554_s19  ;;  %22 = sbr.rel (!%p20_p2) target bundleno = 3 (0x3), region = 98 }
 0xb11   :  { %1196 = vsyncpa [#allocation3], 1 }
 0xb12   :  { %1198 = vsyncpa [#allocation3 + $0x1], 1 }

</bundles_post_ra>
